<compile_context>
chip_gen: v7x
topology: tpu7x:2x2x1
jax: 0.10.0
libtpu: 0.0.40
codegen_flags: <defaults>
</compile_context>

<pallas_src>
import functools

import numpy as np
import jax
import jax.numpy as jnp
from jax.experimental import pallas as pl
from jax.experimental.pallas import tpu as pltpu


def _round_up(a, b):
    return -(-a // b) * b


# ----------------------------- Pallas kernel --------------------------------
def _convt_fold_kernel(x_ref, l_ref, r_ref, o_ref, tcat_ref, *, K, CHp):
    # x_ref    : (1, FHp, Nb*W)     lane axis = (image, W)   (lane-dense batch)
    # l_ref    : (K*CHp, FHp)       stacked left operators, rows ordered (kw, c, h')
    # r_ref    : (K*Nb*W, Nb*Wc)    stacked block-diagonal right operators
    # o_ref    : (1, CHp, Nb*Wc)
    # tcat_ref : (CHp, K*Nb*W)      scratch: the K intermediate slabs, lane-concatenated
    x = x_ref[0]
    nbw = x.shape[-1]

    # One MXU pass over all K kernel columns (was K matmuls + K f32 adds).
    t = jnp.dot(l_ref[...], x, preferred_element_type=jnp.float32)    # (K*CHp, NbW)
    t = t.reshape(K, CHp, nbw)

    # Reshuffle (K, CHp, NbW) -> (CHp, K*NbW) with static-offset lane stores.
    for k in range(K):
        tcat_ref[:, k * nbw:(k + 1) * nbw] = t[k].astype(tcat_ref.dtype)

    # One MXU pass contracting over (kw, image, W); f32 accumulation in the MXU.
    o_ref[0] = jnp.dot(tcat_ref[...], r_ref[...],
                       preferred_element_type=jnp.float32).astype(o_ref.dtype)


# ----------------------------- helpers ---------------------------------------
def _fold_matrix(full, p):
    """Adjoint of 1-D symmetric padding by p on each side: (full - 2p, full)."""
    core = full - 2 * p
    m = np.zeros((core, full), np.float32)
    for i in range(core):
        m[i, p + i] = 1.0
    for j in range(p):
        m[j, p - 1 - j] += 1.0
        m[core - 1 - j, core + p + j] += 1.0
    return m


def _blur_weight(w_base, stride):
    """PadConvScale2D.get_weight: blur the 3x3 weight stride//2 times (pad=4)."""
    F, C, k, _ = w_base.shape
    if stride <= 1:
        return w_base
    np_k = np.asarray([1, 4, 6, 4, 1], dtype=np.float32)[:, None]
    np_k = np_k @ np_k.T
    np_k /= np_k.sum()
    blur = jnp.asarray(np_k.reshape(1, 1, 5, 5))
    w = w_base.reshape(F * C, 1, k, k)
    for _ in range(stride // 2):
        w = jax.lax.conv_general_dilated(
            w, blur, window_strides=(1, 1), padding=((4, 4), (4, 4)),
            dimension_numbers=("NCHW", "OIHW", "NCHW"),
            precision=jax.lax.Precision.HIGHEST)
    K = k + 2 * stride
    return w.reshape(F, C, K, K)


def _scatter_matrix(K, n_in, n_out, stride):
    """S[k, o, i] = 1 iff o == stride*i + k (conv_transpose index map, incl. boundary)."""
    S = np.zeros((K, n_out, n_in), np.float32)
    for k in range(K):
        for i in range(n_in):
            o = stride * i + k
            if o < n_out:
                S[k, o, i] = 1.0
    return S


# ------------------------------ wrapper ---------------------------------------
def pad_conv_scale_transpose2d(x_nchw, w_base, output_shape, *, stride=2,
                               compute_dtype=jnp.float32, lane_batch=None):
    N, F_in, H, W = x_nchw.shape
    w = _blur_weight(w_base, stride)                      # (F, C, K, K)
    F, C, K, _ = w.shape
    assert F == F_in

    # output_padding from the requested output_shape (as in PadConv2D.backward)
    op_h = output_shape[2] - ((H - 1) * stride + 1)
    op_w = output_shape[3] - ((W - 1) * stride + 1)
    assert 0 <= op_h < stride + K and 0 <= op_w < stride + K

    HO = (H - 1) * stride + K + op_h                      # conv_transpose output height
    WO = (W - 1) * stride + K + op_w
    p = K // 2                                            # optox padding = 3 for K=7
    Hc, Wc = HO - 2 * p, WO - 2 * p
    assert (Hc, Wc) == (output_shape[2], output_shape[3])

    # Lane batching: pack Nb images along the lane axis so the output last dim
    # approaches a full vreg width (128).  TODO(synk): target ~256 on v6e/v7x,
    # and keep >=2 grid steps on v7x for two-TensorCore parallelism.
    if lane_batch is None:
        lane_batch = max(1, min(N, -(-128 // Wc)))
    Nb = int(lane_batch)
    G = -(-N // Nb)
    Npad = G * Nb

    FH, CH = F * H, C * Hc
    FHp = _round_up(FH, 8)                                # sublane-aligned contraction dim
    CHp = _round_up(CH, 8)                                # sublane-aligned output rows
    NbW, NbWc = Nb * W, Nb * Wc

    # --- small per-kw operator matrices (no Kronecker product, no zero dilation) ---
    fh = _fold_matrix(HO, p)                              # (Hc, HO) symmetric-pad H adjoint
    fw = _fold_matrix(WO, p)                              # (Wc, WO) symmetric-pad W adjoint
    SH = _scatter_matrix(K, H, HO, stride)                # (K, HO, H) stride-2 H scatter
    SW = _scatter_matrix(K, W, WO, stride)                # (K, WO, W) stride-2 W scatter

    fhS = np.einsum("ho,koi->khi", fh, SH)                # (K, Hc, H)  fold_H . scatter_H
    Rk = np.einsum("koi,wo->kiw", SW, fw)                 # (K, W, Wc)  scatter_W^T . fold_W^T

    # L_big[(kw, c, h'), (f, ih)] = sum_kh w[f,c,kh,kw] * fhS[kh, h', ih]
    L = jnp.einsum("fckw,khi->wchfi", w, jnp.asarray(fhS),
                   precision=jax.lax.Precision.HIGHEST)   # (K, C, Hc, F, H)
    L = L.reshape(K, CH, FH)
    L = jnp.pad(L, ((0, 0), (0, CHp - CH), (0, FHp - FH)))
    L_big = L.reshape(K * CHp, FHp).astype(compute_dtype)

    # R_big[(kw, nb, iw), (nb', w')] = Rk[kw, iw, w'] * delta(nb, nb')   (block-diag over images)
    R_bd = np.einsum("kiw,nm->knimw", Rk, np.eye(Nb, dtype=np.float32))
    R_big = jnp.asarray(R_bd.reshape(K * NbW, NbWc)).astype(compute_dtype)

    # --- input layout: (G, FHp, Nb*W); image W (x Nb) on the lane axis ---
    xp = x_nchw
    if Npad != N:
        xp = jnp.pad(xp, ((0, Npad - N), (0, 0), (0, 0), (0, 0)))
    x_rows = (xp.reshape(G, Nb, F, H, W)
                .transpose(0, 2, 3, 1, 4)                 # (G, F, H, Nb, W)
                .reshape(G, FH, NbW))
    x_rows = jnp.pad(x_rows, ((0, 0), (0, FHp - FH), (0, 0))).astype(compute_dtype)

    kernel = functools.partial(_convt_fold_kernel, K=K, CHp=CHp)

    itemsize = jnp.dtype(compute_dtype).itemsize
    flops = 2 * G * (K * CHp * FHp * NbW + CHp * K * NbW * NbWc)
    bytes_accessed = (x_rows.size * x_rows.dtype.itemsize
                      + L_big.size * L_big.dtype.itemsize
                      + R_big.size * R_big.dtype.itemsize
                      + G * CHp * NbWc * x_nchw.dtype.itemsize)
    vmem_need = ((2 * FHp * NbW + K * CHp * FHp + K * NbW * NbWc
                  + CHp * K * NbW) * itemsize
                 + 2 * CHp * NbWc * jnp.dtype(x_nchw.dtype).itemsize)

    out = pl.pallas_call(
        kernel,
        out_shape=jax.ShapeDtypeStruct((G, CHp, NbWc), x_nchw.dtype),
        grid=(G,),
        in_specs=[
            pl.BlockSpec((1, FHp, NbW), lambda g: (g, 0, 0)),
            # grid-invariant operators: fully VMEM-resident, single-buffered
            pl.BlockSpec((K * CHp, FHp), lambda g: (0, 0),
                         pipeline_mode=pl.Buffered(1)),
            pl.BlockSpec((K * NbW, NbWc), lambda g: (0, 0),
                         pipeline_mode=pl.Buffered(1)),
        ],
        out_specs=pl.BlockSpec((1, CHp, NbWc), lambda g: (g, 0, 0)),
        scratch_shapes=[pltpu.VMEM((CHp, K * NbW), compute_dtype)],
        compiler_params=pltpu.CompilerParams(
            dimension_semantics=("parallel",),
            vmem_limit_bytes=int(min(64 * 2**20, max(32 * 2**20, 4 * vmem_need))),
        ),
        cost_estimate=pl.CostEstimate(flops=int(flops), transcendentals=0,
                                      bytes_accessed=int(bytes_accessed)),
    )(x_rows, L_big, R_big)

    # (G, CHp, Nb*Wc) -> (N, C, Hc, Wc)   (pure layout plumbing)
    out = out[:, :CH, :].reshape(G, C, Hc, Nb, Wc)
    out = out.transpose(0, 3, 1, 2, 4).reshape(Npad, C, Hc, Wc)
    return out[:N]


# --------------------------- pure-JAX reference ------------------------------
def _reference(x_nchw, w_base, output_shape, *, stride=2):
    w = _blur_weight(w_base, stride)                      # (F, C, K, K)
    F, C, K, _ = w.shape
    N, _, H, W = x_nchw.shape
    op_h = output_shape[2] - ((H - 1) * stride + 1)
    op_w = output_shape[3] - ((W - 1) * stride + 1)
    y = jax.lax.conv_general_dilated(
        x_nchw, jnp.transpose(w[:, :, ::-1, ::-1], (1, 0, 2, 3)),
        window_strides=(1, 1),
        padding=((K - 1, K - 1 + op_h), (K - 1, K - 1 + op_w)),
        lhs_dilation=(stride, stride),
        dimension_numbers=("NCHW", "OIHW", "NCHW"),
        precision=jax.lax.Precision.HIGHEST)
    p = K // 2
    HO, WO = y.shape[2], y.shape[3]
    fh = jnp.asarray(_fold_matrix(HO, p))
    fw = jnp.asarray(_fold_matrix(WO, p))
    y = jnp.einsum("ho,ncow->nchw", fh, y, precision=jax.lax.Precision.HIGHEST)
    y = jnp.einsum("vw,nchw->nchv", fw, y, precision=jax.lax.Precision.HIGHEST)
    return y


# --------------------------------- main --------------------------------------
if __name__ == "__main__":
    key = jax.random.PRNGKey(0)
    k_w, k_x = jax.random.split(key)

    in_channels, filters, kernel_size, stride = 4, 6, 3, 2
    N, H, W = 2, 9, 9
    # conv_transpose input has `filters` channels, output has `in_channels`
    output_shape = (N, in_channels, 18, 18)

    # torch.nn.init.normal_(weight, 0, sqrt(1 / (in_channels * k**2)))
    w_base = (jax.random.normal(
        k_w, (filters, in_channels, kernel_size, kernel_size), jnp.float32)
        * np.sqrt(1.0 / (in_channels * kernel_size ** 2)))
    x = jax.random.normal(k_x, (N, filters, H, W), jnp.float32)

    y = pad_conv_scale_transpose2d(x, w_base, output_shape, stride=stride)
    y = jax.block_until_ready(y)
    assert y.shape == output_shape, y.shape

    ref = jax.block_until_ready(_reference(x, w_base, output_shape, stride=stride))
    np.testing.assert_allclose(np.asarray(y), np.asarray(ref), rtol=1e-3, atol=1e-4)

    print("KERNEL_OK")
</pallas_src>

<mosaic_0001>
module attributes {stable_mosaic.version = 11 : i64} {
  func.func @_convt_fold_kernel(%arg0: i32, %arg1: memref<1x56x18xf32, #tpu.memory_space<vmem>>, %arg2: memref<504x56xf32, #tpu.memory_space<vmem>>, %arg3: memref<126x36xf32, #tpu.memory_space<vmem>>, %arg4: memref<1x72x36xf32, #tpu.memory_space<vmem>>, %arg5: memref<72x126xf32, #tpu.memory_space<vmem>>) attributes {dimension_semantics = [#tpu.dimension_semantics<parallel>], iteration_bounds = array<i64: 1>, scalar_prefetch = 0 : i64, scratch_operands = 1 : i64, tpu.core_type = #tpu.core_type<tc>, window_params = [{transform_indices = @transform_0, window_bounds = array<i64: 1, 56, 18>}, {pipeline_mode = #tpu.pipeline_mode<synchronous>, transform_indices = @transform_1, window_bounds = array<i64: 504, 56>}, {pipeline_mode = #tpu.pipeline_mode<synchronous>, transform_indices = @transform_2, window_bounds = array<i64: 126, 36>}, {transform_indices = @transform_3, window_bounds = array<i64: 1, 72, 36>}]} {
    %c0 = arith.constant 0 : index
    %c0_0 = arith.constant 0 : index
    %c0_1 = arith.constant 0 : index
    %0 = vector.load %arg1[%c0, %c0_0, %c0_1] : memref<1x56x18xf32, #tpu.memory_space<vmem>>, vector<1x56x18xf32>
    %1 = vector.shape_cast %0 : vector<1x56x18xf32> to vector<56x18xf32>
    %c0_2 = arith.constant 0 : index
    %c0_3 = arith.constant 0 : index
    %2 = vector.load %arg2[%c0_2, %c0_3] : memref<504x56xf32, #tpu.memory_space<vmem>>, vector<504x56xf32>
    %cst = arith.constant dense<0.000000e+00> : vector<504x18xf32>
    %3 = tpu.matmul %2, %1, %cst {dimension_numbers = #tpu.dot_dimension_numbers<[1], [0], [0], [1], [0, 0, 1, 1], [], []>} : vector<504x56xf32>, vector<56x18xf32>, vector<504x18xf32> -> vector<504x18xf32>
    %4 = vector.shape_cast %3 : vector<504x18xf32> to vector<7x72x18xf32>
    %5 = vector.extract_strided_slice %4 {offsets = [0, 0, 0], sizes = [1, 72, 18], strides = [1, 1, 1]} : vector<7x72x18xf32> to vector<1x72x18xf32>
    %6 = vector.shape_cast %5 : vector<1x72x18xf32> to vector<72x18xf32>
    %c0_4 = arith.constant 0 : index
    %c0_5 = arith.constant 0 : index
    %7 = vector.load %arg5[%c0_4, %c0_5] : memref<72x126xf32, #tpu.memory_space<vmem>>, vector<72x18xf32>
    tpu.vector_store %arg5[%c0_4, %c0_5], %6 {strides = array<i32>} : memref<72x126xf32, #tpu.memory_space<vmem>>, vector<72x18xf32>,
    %8 = vector.extract_strided_slice %4 {offsets = [1, 0, 0], sizes = [1, 72, 18], strides = [1, 1, 1]} : vector<7x72x18xf32> to vector<1x72x18xf32>
    %9 = vector.shape_cast %8 : vector<1x72x18xf32> to vector<72x18xf32>
    %c0_6 = arith.constant 0 : index
    %c18 = arith.constant 18 : index
    %10 = vector.load %arg5[%c0_6, %c18] : memref<72x126xf32, #tpu.memory_space<vmem>>, vector<72x18xf32>
    tpu.vector_store %arg5[%c0_6, %c18], %9 {strides = array<i32>} : memref<72x126xf32, #tpu.memory_space<vmem>>, vector<72x18xf32>,
    %11 = vector.extract_strided_slice %4 {offsets = [2, 0, 0], sizes = [1, 72, 18], strides = [1, 1, 1]} : vector<7x72x18xf32> to vector<1x72x18xf32>
    %12 = vector.shape_cast %11 : vector<1x72x18xf32> to vector<72x18xf32>
    %c0_7 = arith.constant 0 : index
    %c36 = arith.constant 36 : index
    %13 = vector.load %arg5[%c0_7, %c36] : memref<72x126xf32, #tpu.memory_space<vmem>>, vector<72x18xf32>
    tpu.vector_store %arg5[%c0_7, %c36], %12 {strides = array<i32>} : memref<72x126xf32, #tpu.memory_space<vmem>>, vector<72x18xf32>,
    %14 = vector.extract_strided_slice %4 {offsets = [3, 0, 0], sizes = [1, 72, 18], strides = [1, 1, 1]} : vector<7x72x18xf32> to vector<1x72x18xf32>
    %15 = vector.shape_cast %14 : vector<1x72x18xf32> to vector<72x18xf32>
    %c0_8 = arith.constant 0 : index
    %c54 = arith.constant 54 : index
    %16 = vector.load %arg5[%c0_8, %c54] : memref<72x126xf32, #tpu.memory_space<vmem>>, vector<72x18xf32>
    tpu.vector_store %arg5[%c0_8, %c54], %15 {strides = array<i32>} : memref<72x126xf32, #tpu.memory_space<vmem>>, vector<72x18xf32>,
    %17 = vector.extract_strided_slice %4 {offsets = [4, 0, 0], sizes = [1, 72, 18], strides = [1, 1, 1]} : vector<7x72x18xf32> to vector<1x72x18xf32>
    %18 = vector.shape_cast %17 : vector<1x72x18xf32> to vector<72x18xf32>
    %c0_9 = arith.constant 0 : index
    %c72 = arith.constant 72 : index
    %19 = vector.load %arg5[%c0_9, %c72] : memref<72x126xf32, #tpu.memory_space<vmem>>, vector<72x18xf32>
    tpu.vector_store %arg5[%c0_9, %c72], %18 {strides = array<i32>} : memref<72x126xf32, #tpu.memory_space<vmem>>, vector<72x18xf32>,
    %20 = vector.extract_strided_slice %4 {offsets = [5, 0, 0], sizes = [1, 72, 18], strides = [1, 1, 1]} : vector<7x72x18xf32> to vector<1x72x18xf32>
    %21 = vector.shape_cast %20 : vector<1x72x18xf32> to vector<72x18xf32>
    %c0_10 = arith.constant 0 : index
    %c90 = arith.constant 90 : index
    %22 = vector.load %arg5[%c0_10, %c90] : memref<72x126xf32, #tpu.memory_space<vmem>>, vector<72x18xf32>
    tpu.vector_store %arg5[%c0_10, %c90], %21 {strides = array<i32>} : memref<72x126xf32, #tpu.memory_space<vmem>>, vector<72x18xf32>,
    %23 = vector.extract_strided_slice %4 {offsets = [6, 0, 0], sizes = [1, 72, 18], strides = [1, 1, 1]} : vector<7x72x18xf32> to vector<1x72x18xf32>
    %24 = vector.shape_cast %23 : vector<1x72x18xf32> to vector<72x18xf32>
    %c0_11 = arith.constant 0 : index
    %c108 = arith.constant 108 : index
    %25 = vector.load %arg5[%c0_11, %c108] : memref<72x126xf32, #tpu.memory_space<vmem>>, vector<72x18xf32>
    tpu.vector_store %arg5[%c0_11, %c108], %24 {strides = array<i32>} : memref<72x126xf32, #tpu.memory_space<vmem>>, vector<72x18xf32>,
    %c0_12 = arith.constant 0 : index
    %c0_13 = arith.constant 0 : index
    %26 = vector.load %arg5[%c0_12, %c0_13] : memref<72x126xf32, #tpu.memory_space<vmem>>, vector<72x126xf32>
    %c0_14 = arith.constant 0 : index
    %c0_15 = arith.constant 0 : index
    %27 = vector.load %arg3[%c0_14, %c0_15] : memref<126x36xf32, #tpu.memory_space<vmem>>, vector<126x36xf32>
    %cst_16 = arith.constant dense<0.000000e+00> : vector<72x36xf32>
    %28 = tpu.matmul %26, %27, %cst_16 {dimension_numbers = #tpu.dot_dimension_numbers<[1], [0], [0], [1], [0, 0, 1, 1], [], []>} : vector<72x126xf32>, vector<126x36xf32>, vector<72x36xf32> -> vector<72x36xf32>
    %c0_17 = arith.constant 0 : index
    %c0_18 = arith.constant 0 : index
    %c0_19 = arith.constant 0 : index
    %29 = vector.load %arg4[%c0_17, %c0_18, %c0_19] : memref<1x72x36xf32, #tpu.memory_space<vmem>>, vector<1x72x36xf32>
    %30 = vector.shape_cast %29 : vector<1x72x36xf32> to vector<72x36xf32>
    %31 = vector.shape_cast %28 : vector<72x36xf32> to vector<1x72x36xf32>
    tpu.vector_store %arg4[%c0_17, %c0_18, %c0_19], %31 {strides = array<i32>} : memref<1x72x36xf32, #tpu.memory_space<vmem>>, vector<1x72x36xf32>,
    return
  }
  func.func @transform_0(%arg0: i32) -> (i32, i32, i32) {
    %c0_i32 = arith.constant 0 : i32
    %c0_i32_0 = arith.constant 0 : i32
    %c0_i32_1 = arith.constant 0 : i32
    return %arg0, %c0_i32, %c0_i32_0 : i32, i32, i32
  }
  func.func @transform_1(%arg0: i32) -> (i32, i32) {
    %c0_i32 = arith.constant 0 : i32
    %c0_i32_0 = arith.constant 0 : i32
    %c0_i32_1 = arith.constant 0 : i32
    return %c0_i32, %c0_i32_0 : i32, i32
  }
  func.func @transform_2(%arg0: i32) -> (i32, i32) {
    %c0_i32 = arith.constant 0 : i32
    %c0_i32_0 = arith.constant 0 : i32
    %c0_i32_1 = arith.constant 0 : i32
    return %c0_i32, %c0_i32_0 : i32, i32
  }
  func.func @transform_3(%arg0: i32) -> (i32, i32, i32) {
    %c0_i32 = arith.constant 0 : i32
    %c0_i32_0 = arith.constant 0 : i32
    %c0_i32_1 = arith.constant 0 : i32
    return %arg0, %c0_i32, %c0_i32_0 : i32, i32, i32
  }
}

</mosaic_0001>

<bundles_post_ra>
// kernel: tpu_custom_call.1
= control target key start
LH: loop header
LB: loop body
LE: loop exit
PB: predicated region body
PF: predicated region fallthrough
CT: control target
= control target key end

     0   :  { %v1603_v0 = vmov 0.0|0.0   ;;  %vm1604_vm0 = vmmov 0   ;;  %v1605_v4 = vmov 0.0   ;;  %vm84_vm1 = vcmask 457728   ;;  %s1606_s12 = smov 72   ;;  %s1607_s24 = smov 18   ;;  %s2324_s0 = inlined_call_operand.vmem [shape: f32[1,56,18], index: 0, kind: input, shape index: {}]   ;;  %s2325_s1 = inlined_call_operand.vmem [shape: f32[504,56], index: 1, kind: input, shape index: {}]   ;;  %s2326_s2 = inlined_call_operand.vmem [shape: f32[126,36], index: 2, kind: input, shape index: {}]   ;;  %s2327_s3 = inlined_call_operand.vmem [shape: f32[1,72,36], index: 3, kind: output, shape index: {}]  }
   0x1   :  { %1551 = vmatprep.subr.bf16.mxu0 %v1603_v0  ;;  %v14_v1 = vld [vmem:[%s2324_s0] sm:$0xff]  ;;  %v15_v2 = vld [vmem:[%s2324_s0 + $0x8] sm:$0xff]  ;;  %v16_v3 = vld [vmem:[%s2324_s0 + $0x10] sm:$0xff]  ;;  %1303 = vmatprep.mubr.msk.f32.mxu0 %vm1604_vm0, %v1605_v4  ;;  %vm654_vm2 = vcmask 146432   ;;  %s1608_s25 = smov 90   ;;  %s1609_s10 = smov 36  }
   0x2   :  { %v1552_v5 = vpack.c.bf16 %v15_v2, %v14_v1  ;;  %v17_v6 = vld [vmem:[%s2324_s0 + $0x18] sm:$0xff]  ;;  %1585 = vmatprep.subr.bf16.mxu1 %v1603_v0  ;;  %1411 = vmatprep.mubr.msk.f32.mxu1 %vm1604_vm0, %v1605_v4  ;;  %v18_v8 = vld [vmem:[%s2324_s0 + $0x20] sm:$0xff]  ;;  %v19_v9 = vld [vmem:[%s2324_s0 + $0x28] sm:$0xff]  ;;  %s1610_s11 = smov 108   ;;  %vm993_vm3 = vcmask 1045504   ;;  %vm1611_vm4 = vmmov 1  }
   0x3   :  { %v1555_v7 = vpack.c.bf16 %v17_v6, %v16_v3  ;;  %v1558_v10 = vpack.c.bf16 %v19_v9, %v18_v8  ;;  %v20_v11 = vld [vmem:[%s2324_s0 + $0x30] sm:$0xff]  ;;  %v21_v12 = vld [vmem:[%s2325_s1] sm:$0xff]  ;;  %v22_v14 = vld [vmem:[%s2325_s1 + $0x8] sm:$0xff]  ;;  %vm700_vm6 = vcmask 294032   ;;  %vm746_vm7 = vcmask 441632  }
   0x4   :  { %1553 = vmatpush3.bf16.msra.mxu0 %v1552_v5  ;;  %1589 = vmatpush3.bf16.msra.mxu1 %v1552_v5  ;;  %v57_v13 = vld [vmem:[%s2325_s1 + $0x120] sm:$0xff]  ;;  %v58_v15 = vld [vmem:[%s2325_s1 + $0x128] sm:$0xff]  ;;  %v23_v16 = vld [vmem:[%s2325_s1 + $0x10] sm:$0xff]  ;;  %vm792_vm8 = vcmask 589232   ;;  %vm838_vm9 = vcmask 736832   ;;  %vm884_vm10 = vcmask 884432  }
   0x5   :  { %1554 = vmatprep.subr.bf16.mxu0 %v1603_v0  ;;  %1586 = vmatprep.subr.bf16.mxu1 %v1603_v0  ;;  %v59_v17 = vld [vmem:[%s2325_s1 + $0x130] sm:$0xff]  ;;  %v24_v18 = vld [vmem:[%s2325_s1 + $0x18] sm:$0xff]  ;;  %v25_v20 = vld [vmem:[%s2325_s1 + $0x20] sm:$0xff]  ;;  %vm930_vm11 = vcmask 1032032   ;;  %vm965_vm12 = vcmask 1031168   ;;  %vm1107_vm13 = vcmask 293888  }
   0x6   :  { %v60_v19 = vld [vmem:[%s2325_s1 + $0x138] sm:$0xff]  ;;  %v61_v21 = vld [vmem:[%s2325_s1 + $0x140] sm:$0xff]  ;;  %v26_v22 = vld [vmem:[%s2325_s1 + $0x28] sm:$0xff] }
   0x7   :  { %v62_v23 = vld [vmem:[%s2325_s1 + $0x148] sm:$0xff]  ;;  %v27_v24 = vld [vmem:[%s2325_s1 + $0x30] sm:$0xff]  ;;  %v28_v26 = vld [vmem:[%s2325_s1 + $0x38] sm:$0xff] }
   0x8   :  { %1556 = vmatpush3.bf16.msra.mxu0 %v1555_v7  ;;  %1590 = vmatpush3.bf16.msra.mxu1 %v1555_v7  ;;  %v63_v25 = vld [vmem:[%s2325_s1 + $0x150] sm:$0xff]  ;;  %v64_v27 = vld [vmem:[%s2325_s1 + $0x158] sm:$0xff]  ;;  %v29_v28 = vld [vmem:[%s2325_s1 + $0x40] sm:$0xff] }
   0x9   :  { %1557 = vmatprep.subr.bf16.mxu0 %v1603_v0  ;;  %1587 = vmatprep.subr.bf16.mxu1 %v1603_v0  ;;  %v65_v29 = vld [vmem:[%s2325_s1 + $0x160] sm:$0xff]  ;;  %v30_v30 = vld [vmem:[%s2325_s1 + $0x48] sm:$0xff]  ;;  %v31_v32 = vld [vmem:[%s2325_s1 + $0x50] sm:$0xff] }
   0xa   :  { %v66_v31 = vld [vmem:[%s2325_s1 + $0x168] sm:$0xff]  ;;  %v67_v33 = vld [vmem:[%s2325_s1 + $0x170] sm:$0xff]  ;;  %v32_v34 = vld [vmem:[%s2325_s1 + $0x58] sm:$0xff] }
   0xb   :  { %v68_v35 = vld [vmem:[%s2325_s1 + $0x178] sm:$0xff]  ;;  %v33_v36 = vld [vmem:[%s2325_s1 + $0x60] sm:$0xff]  ;;  %v34_v38 = vld [vmem:[%s2325_s1 + $0x68] sm:$0xff] }
   0xc   :  { %1559 = vmatpush3.bf16.msra.mxu0 %v1558_v10  ;;  %1591 = vmatpush3.bf16.msra.mxu1 %v1558_v10  ;;  %v69_v37 = vld [vmem:[%s2325_s1 + $0x180] sm:$0xff]  ;;  %v70_v39 = vld [vmem:[%s2325_s1 + $0x188] sm:$0xff]  ;;  %v35_v40 = vld [vmem:[%s2325_s1 + $0x70] sm:$0xff] }
   0xd   :  { %1301 = vmatprep.subr.mxu0 %v1605_v4  ;;  %1588 = vmatprep.subr.mxu1 %v1605_v4  ;;  %v71_v41 = vld [vmem:[%s2325_s1 + $0x190] sm:$0xff]  ;;  %v36_v42 = vld [vmem:[%s2325_s1 + $0x78] sm:$0xff]  ;;  %v37_v44 = vld [vmem:[%s2325_s1 + $0x80] sm:$0xff] }
   0xe   :  { %v72_v43 = vld [vmem:[%s2325_s1 + $0x198] sm:$0xff]  ;;  %v73_v45 = vld [vmem:[%s2325_s1 + $0x1a0] sm:$0xff]  ;;  %v38_v46 = vld [vmem:[%s2325_s1 + $0x88] sm:$0xff] }
   0xf   :  { %v74_v47 = vld [vmem:[%s2325_s1 + $0x1a8] sm:$0xff]  ;;  %v39_v48 = vld [vmem:[%s2325_s1 + $0x90] sm:$0xff]  ;;  %v40_v50 = vld [vmem:[%s2325_s1 + $0x98] sm:$0xff] }
  0x10   :  { %1302 = vmatpush3.msra.mxu0 %v20_v11  ;;  %1592 = vmatpush3.msra.mxu1 %v20_v11  ;;  %v75_v49 = vld [vmem:[%s2325_s1 + $0x1b0] sm:$0xff]  ;;  %v76_v51 = vld [vmem:[%s2325_s1 + $0x1b8] sm:$0xff]  ;;  %v41_v52 = vld [vmem:[%s2325_s1 + $0xa0] sm:$0xff] }
  0x11   :  { %1304 = vmatmul.mubr.msk.f32.vlgmr.msra.gmra.mrb[0].mxu0 %vm84_vm1, %v21_v12  ;;  %1412 = vmatmul.mubr.msk.f32.vlgmr.msra.gmra.mrb[0].mxu1 %vm84_vm1, %v57_v13  ;;  %v77_v53 = vld [vmem:[%s2325_s1 + $0x1c0] sm:$0xff]  ;;  %v42_v54 = vld [vmem:[%s2325_s1 + $0xa8] sm:$0xff]  ;;  %v43_v56 = vld [vmem:[%s2325_s1 + $0xb0] sm:$0xff] }
  0x12   :  { %1306 = vmatprep.mubr.msk.f32.mxu0 %vm1604_vm0, %v1605_v4  ;;  %1414 = vmatprep.mubr.msk.f32.mxu1 %vm1604_vm0, %v1605_v4  ;;  %v78_v55 = vld [vmem:[%s2325_s1 + $0x1c8] sm:$0xff]  ;;  %v79_v57 = vld [vmem:[%s2325_s1 + $0x1d0] sm:$0xff]  ;;  %v44_v58 = vld [vmem:[%s2325_s1 + $0xb8] sm:$0xff] }
  0x13   :  { %1560 = vmatprep.subr.bf16.mxu1 %v1603_v0  ;;  %v80_v59 = vld [vmem:[%s2325_s1 + $0x1d8] sm:$0xff]  ;;  %v45_v60 = vld [vmem:[%s2325_s1 + $0xc0] sm:$0xff]  ;;  %v46_v62 = vld [vmem:[%s2325_s1 + $0xc8] sm:$0xff] }
  0x14   :  { %v81_v61 = vld [vmem:[%s2325_s1 + $0x1e0] sm:$0xff]  ;;  %v82_v63 = vld [vmem:[%s2325_s1 + $0x1e8] sm:$0xff]  ;;  %v47_v1 = vld [vmem:[%s2325_s1 + $0xd0] sm:$0xff] }
  0x15   :  { %1307 = vmatmul.mubr.msk.f32.gmra.mrb[2].mxu0 %vm84_vm1, %v22_v14  ;;  %1415 = vmatmul.mubr.msk.f32.gmra.mrb[2].mxu1 %vm84_vm1, %v58_v15  ;;  %v83_v2 = vld [vmem:[%s2325_s1 + $0x1f0] sm:$0xff]  ;;  %v48_v3 = vld [vmem:[%s2325_s1 + $0xd8] sm:$0xff]  ;;  %v49_v5 = vld [vmem:[%s2325_s1 + $0xe0] sm:$0xff] }
  0x16   :  { %1309 = vmatprep.mubr.msk.f32.mxu0 %vm1604_vm0, %v1605_v4  ;;  %1417 = vmatprep.mubr.msk.f32.mxu1 %vm1604_vm0, %v1605_v4  ;;  %v50_v6 = vld [vmem:[%s2325_s1 + $0xe8] sm:$0xff]  ;;  %v51_v7 = vld [vmem:[%s2325_s1 + $0xf0] sm:$0xff]  ;;  %v52_v8 = vld [vmem:[%s2325_s1 + $0xf8] sm:$0xff] }
  0x17   :  { %v53_v9 = vld [vmem:[%s2325_s1 + $0x100] sm:$0xff]  ;;  %v54_v10 = vld [vmem:[%s2325_s1 + $0x108] sm:$0xff]  ;;  %v55_v11 = vld [vmem:[%s2325_s1 + $0x110] sm:$0xff] }
  0x18   :  { %v56_v12 = vld [vmem:[%s2325_s1 + $0x118] sm:$0xff]  ;;  %vm1583_vm5 = vmpackc.low %vm993_vm3, %vm1611_vm4 }
  0x19   :  { %1310 = vmatmul.mubr.msk.f32.gmra.mrb[4].mxu0 %vm84_vm1, %v23_v16  ;;  %1418 = vmatmul.mubr.msk.f32.gmra.mrb[4].mxu1 %vm84_vm1, %v59_v17  ;;  %v949_v17 = vld [vmem:[%s2326_s2] sm:$0xff] }
  0x1a   :  { %1312 = vmatprep.mubr.msk.f32.mxu0 %vm1604_vm0, %v1605_v4  ;;  %1420 = vmatprep.mubr.msk.f32.mxu1 %vm1604_vm0, %v1605_v4 }
  0x1d   :  { %1313 = vmatmul.mubr.msk.f32.gmra.mrb[6].mxu0 %vm84_vm1, %v24_v18  ;;  %1421 = vmatmul.mubr.msk.f32.gmra.mrb[6].mxu1 %vm84_vm1, %v60_v19  ;;  %v950_v18 = vld [vmem:[%s2326_s2 + $0x8] sm:$0xff] }
  0x1e   :  { %1315 = vmatprep.mubr.msk.f32.mxu0 %vm1604_vm0, %v1605_v4  ;;  %1423 = vmatprep.mubr.msk.f32.mxu1 %vm1604_vm0, %v1605_v4  ;;  %v1561_v19 = vpack.c.bf16 %v950_v18, %v949_v17 }
  0x20   :  { %1562 = vmatpush3.bf16.msra.mxu1 %v1561_v19 }
  0x21   :  { %1316 = vmatmul.mubr.msk.f32.gmra.mrb[8].mxu0 %vm84_vm1, %v25_v20  ;;  %1424 = vmatmul.mubr.msk.f32.gmra.mrb[8].mxu1 %vm84_vm1, %v61_v21 }
  0x22   :  { %1318 = vmatprep.mubr.msk.f32.mxu0 %vm1604_vm0, %v1605_v4  ;;  %1426 = vmatprep.mubr.msk.f32.mxu1 %vm1604_vm0, %v1605_v4 }
  0x23   :  { %1563 = vmatprep.subr.bf16.mxu1 %v1603_v0 }
  0x25   :  { %1319 = vmatmul.mubr.msk.f32.gmra.mrb[10].mxu0 %vm84_vm1, %v26_v22  ;;  %1427 = vmatmul.mubr.msk.f32.gmra.mrb[10].mxu1 %vm84_vm1, %v62_v23 }
  0x26   :  { %1321 = vmatprep.mubr.msk.f32.mxu0 %vm1604_vm0, %v1605_v4  ;;  %1429 = vmatprep.mubr.msk.f32.mxu1 %vm1604_vm0, %v1605_v4 }
  0x29   :  { %1322 = vmatmul.mubr.msk.f32.gmra.mrb[12].mxu0 %vm84_vm1, %v27_v24  ;;  %1430 = vmatmul.mubr.msk.f32.gmra.mrb[12].mxu1 %vm84_vm1, %v63_v25 }
  0x2a   :  { %1324 = vmatprep.mubr.msk.f32.mxu0 %vm1604_vm0, %v1605_v4  ;;  %1432 = vmatprep.mubr.msk.f32.mxu1 %vm1604_vm0, %v1605_v4 }
  0x2d   :  { %1325 = vmatmul.mubr.msk.f32.gmra.mrb[14].mxu0 %vm84_vm1, %v28_v26  ;;  %1433 = vmatmul.mubr.msk.f32.gmra.mrb[14].mxu1 %vm84_vm1, %v64_v27 }
  0x2e   :  { %1327 = vmatprep.mubr.msk.f32.mxu0 %vm1604_vm0, %v1605_v4  ;;  %1435 = vmatprep.mubr.msk.f32.mxu1 %vm1604_vm0, %v1605_v4 }
  0x31   :  { %1328 = vmatmul.mubr.msk.f32.gmra.mrb[16].mxu0 %vm84_vm1, %v29_v28  ;;  %1436 = vmatmul.mubr.msk.f32.gmra.mrb[16].mxu1 %vm84_vm1, %v65_v29 }
  0x32   :  { %1330 = vmatprep.mubr.msk.f32.mxu0 %vm1604_vm0, %v1605_v4  ;;  %1438 = vmatprep.mubr.msk.f32.mxu1 %vm1604_vm0, %v1605_v4 }
  0x35   :  { %1331 = vmatmul.mubr.msk.f32.gmra.mrb[18].mxu0 %vm84_vm1, %v30_v30  ;;  %1439 = vmatmul.mubr.msk.f32.gmra.mrb[18].mxu1 %vm84_vm1, %v66_v31 }
  0x36   :  { %1333 = vmatprep.mubr.msk.f32.mxu0 %vm1604_vm0, %v1605_v4  ;;  %1441 = vmatprep.mubr.msk.f32.mxu1 %vm1604_vm0, %v1605_v4 }
  0x39   :  { %1334 = vmatmul.mubr.msk.f32.gmra.mrb[20].mxu0 %vm84_vm1, %v31_v32  ;;  %1442 = vmatmul.mubr.msk.f32.gmra.mrb[20].mxu1 %vm84_vm1, %v67_v33 }
  0x3a   :  { %1336 = vmatprep.mubr.msk.f32.mxu0 %vm1604_vm0, %v1605_v4  ;;  %1444 = vmatprep.mubr.msk.f32.mxu1 %vm1604_vm0, %v1605_v4 }
  0x3d   :  { %1337 = vmatmul.mubr.msk.f32.gmra.mrb[22].mxu0 %vm84_vm1, %v32_v34  ;;  %1445 = vmatmul.mubr.msk.f32.gmra.mrb[22].mxu1 %vm84_vm1, %v68_v35 }
  0x3e   :  { %1339 = vmatprep.mubr.msk.f32.mxu0 %vm1604_vm0, %v1605_v4  ;;  %1447 = vmatprep.mubr.msk.f32.mxu1 %vm1604_vm0, %v1605_v4 }
  0x41   :  { %1340 = vmatmul.mubr.msk.f32.gmra.mrb[24].mxu0 %vm84_vm1, %v33_v36  ;;  %1448 = vmatmul.mubr.msk.f32.gmra.mrb[24].mxu1 %vm84_vm1, %v69_v37  ;;  %v951_v36 = vld [vmem:[%s2326_s2 + $0x10] sm:$0xff]  ;;  %v952_v37 = vld [vmem:[%s2326_s2 + $0x18] sm:$0xff] }
  0x42   :  { %1342 = vmatprep.mubr.msk.f32.mxu0 %vm1604_vm0, %v1605_v4  ;;  %1450 = vmatprep.mubr.msk.f32.mxu1 %vm1604_vm0, %v1605_v4 }
  0x45   :  { %1343 = vmatmul.mubr.msk.f32.gmra.mrb[26].mxu0 %vm84_vm1, %v34_v38  ;;  %1451 = vmatmul.mubr.msk.f32.gmra.mrb[26].mxu1 %vm84_vm1, %v70_v39  ;;  %v1564_v38 = vpack.c.bf16 %v952_v37, %v951_v36 }
  0x46   :  { %1345 = vmatprep.mubr.msk.f32.mxu0 %vm1604_vm0, %v1605_v4  ;;  %1453 = vmatprep.mubr.msk.f32.mxu1 %vm1604_vm0, %v1605_v4 }
  0x47   :  { %1565 = vmatpush3.bf16.msra.mxu1 %v1564_v38 }
  0x48   :  { %1566 = vmatprep.subr.bf16.mxu1 %v1603_v0 }
  0x49   :  { %1346 = vmatmul.mubr.msk.f32.gmra.mrb[28].mxu0 %vm84_vm1, %v35_v40  ;;  %1454 = vmatmul.mubr.msk.f32.gmra.mrb[28].mxu1 %vm84_vm1, %v71_v41 }
  0x4a   :  { %1348 = vmatprep.mubr.msk.f32.mxu0 %vm1604_vm0, %v1605_v4  ;;  %1456 = vmatprep.mubr.msk.f32.mxu1 %vm1604_vm0, %v1605_v4 }
  0x4d   :  { %1349 = vmatmul.mubr.msk.f32.gmra.mrb[30].mxu0 %vm84_vm1, %v36_v42  ;;  %1457 = vmatmul.mubr.msk.f32.gmra.mrb[30].mxu1 %vm84_vm1, %v72_v43 }
  0x4e   :  { %1351 = vmatprep.mubr.msk.f32.mxu0 %vm1604_vm0, %v1605_v4  ;;  %1459 = vmatprep.mubr.msk.f32.mxu1 %vm1604_vm0, %v1605_v4 }
  0x51   :  { %1352 = vmatmul.mubr.msk.f32.gmra.mrb[32].mxu0 %vm84_vm1, %v37_v44  ;;  %1460 = vmatmul.mubr.msk.f32.gmra.mrb[32].mxu1 %vm84_vm1, %v73_v45 }
  0x52   :  { %1354 = vmatprep.mubr.msk.f32.mxu0 %vm1604_vm0, %v1605_v4  ;;  %1462 = vmatprep.mubr.msk.f32.mxu1 %vm1604_vm0, %v1605_v4 }
  0x55   :  { %1355 = vmatmul.mubr.msk.f32.gmra.mrb[34].mxu0 %vm84_vm1, %v38_v46  ;;  %1463 = vmatmul.mubr.msk.f32.gmra.mrb[34].mxu1 %vm84_vm1, %v74_v47 }
  0x56   :  { %1357 = vmatprep.mubr.msk.f32.mxu0 %vm1604_vm0, %v1605_v4  ;;  %1465 = vmatprep.mubr.msk.f32.mxu1 %vm1604_vm0, %v1605_v4 }
  0x59   :  { %1358 = vmatmul.mubr.msk.f32.gmra.mrb[36].mxu0 %vm84_vm1, %v39_v48  ;;  %1466 = vmatmul.mubr.msk.f32.gmra.mrb[36].mxu1 %vm84_vm1, %v75_v49 }
  0x5a   :  { %1360 = vmatprep.mubr.msk.f32.mxu0 %vm1604_vm0, %v1605_v4  ;;  %1468 = vmatprep.mubr.msk.f32.mxu1 %vm1604_vm0, %v1605_v4 }
  0x5d   :  { %1361 = vmatmul.mubr.msk.f32.gmra.mrb[38].mxu0 %vm84_vm1, %v40_v50  ;;  %1469 = vmatmul.mubr.msk.f32.gmra.mrb[38].mxu1 %vm84_vm1, %v76_v51 }
  0x5e   :  { %1363 = vmatprep.mubr.msk.f32.mxu0 %vm1604_vm0, %v1605_v4  ;;  %1471 = vmatprep.mubr.msk.f32.mxu1 %vm1604_vm0, %v1605_v4 }
  0x61   :  { %1364 = vmatmul.mubr.msk.f32.gmra.mrb[40].mxu0 %vm84_vm1, %v41_v52  ;;  %1472 = vmatmul.mubr.msk.f32.gmra.mrb[40].mxu1 %vm84_vm1, %v77_v53  ;;  %v953_v53 = vld [vmem:[%s2326_s2 + $0x20] sm:$0xff] }
  0x62   :  { %1366 = vmatprep.mubr.msk.f32.mxu0 %vm1604_vm0, %v1605_v4  ;;  %1474 = vmatprep.mubr.msk.f32.mxu1 %vm1604_vm0, %v1605_v4 }
  0x65   :  { %1367 = vmatmul.mubr.msk.f32.gmra.mrb[42].mxu0 %vm84_vm1, %v42_v54  ;;  %1475 = vmatmul.mubr.msk.f32.gmra.mrb[42].mxu1 %vm84_vm1, %v78_v55  ;;  %v954_v54 = vld [vmem:[%s2326_s2 + $0x28] sm:$0xff] }
  0x66   :  { %1369 = vmatprep.mubr.msk.f32.mxu0 %vm1604_vm0, %v1605_v4  ;;  %1477 = vmatprep.mubr.msk.f32.mxu1 %vm1604_vm0, %v1605_v4 }
  0x69   :  { %1370 = vmatmul.mubr.msk.f32.gmra.mrb[44].mxu0 %vm84_vm1, %v43_v56  ;;  %1478 = vmatmul.mubr.msk.f32.gmra.mrb[44].mxu1 %vm84_vm1, %v79_v57  ;;  %v1567_v57 = vpack.c.bf16 %v954_v54, %v953_v53 }
  0x6a   :  { %1372 = vmatprep.mubr.msk.f32.mxu0 %vm1604_vm0, %v1605_v4  ;;  %1480 = vmatprep.mubr.msk.f32.mxu1 %vm1604_vm0, %v1605_v4 }
  0x6b   :  { %1568 = vmatpush3.bf16.msra.mxu1 %v1567_v57 }
  0x6c   :  { %1569 = vmatprep.subr.bf16.mxu1 %v1603_v0 }
  0x6d   :  { %1373 = vmatmul.mubr.msk.f32.gmra.mrb[46].mxu0 %vm84_vm1, %v44_v58  ;;  %1481 = vmatmul.mubr.msk.f32.gmra.mrb[46].mxu1 %vm84_vm1, %v80_v59 }
  0x6e   :  { %1375 = vmatprep.mubr.msk.f32.mxu0 %vm1604_vm0, %v1605_v4  ;;  %1483 = vmatprep.mubr.msk.f32.mxu1 %vm1604_vm0, %v1605_v4 }
  0x71   :  { %1376 = vmatmul.mubr.msk.f32.gmra.mrb[48].mxu0 %vm84_vm1, %v45_v60  ;;  %1484 = vmatmul.mubr.msk.f32.gmra.mrb[48].mxu1 %vm84_vm1, %v81_v61 }
  0x72   :  { %1378 = vmatprep.mubr.msk.f32.mxu0 %vm1604_vm0, %v1605_v4  ;;  %1486 = vmatprep.mubr.msk.f32.mxu1 %vm1604_vm0, %v1605_v4 }
  0x75   :  { %1379 = vmatmul.mubr.msk.f32.gmra.mrb[50].mxu0 %vm84_vm1, %v46_v62  ;;  %1487 = vmatmul.mubr.msk.f32.gmra.mrb[50].mxu1 %vm84_vm1, %v82_v63 }
  0x76   :  { %1381 = vmatprep.mubr.msk.f32.mxu0 %vm1604_vm0, %v1605_v4  ;;  %1489 = vmatprep.mubr.msk.f32.mxu1 %vm1604_vm0, %v1605_v4 }
  0x79   :  { %1382 = vmatmul.mubr.msk.f32.gmra.mrb[52].mxu0 %vm84_vm1, %v47_v1  ;;  %1490 = vmatmul.mubr.msk.f32.gmra.mrb[52].mxu1 %vm84_vm1, %v83_v2 }
  0x7a   :  { %1384 = vmatprep.mubr.msk.f32.mxu0 %vm1604_vm0, %v1605_v4  ;;  %1524 = vmatprep.mubr.msk.f32.mxu1 %vm1604_vm0, %v1605_v4 }
  0x7d   :  { %1385 = vmatmul.mubr.msk.f32.gmra.mrb[54].mxu0 %vm84_vm1, %v48_v3 }
  0x7e   :  { %1387 = vmatprep.mubr.msk.f32.mxu0 %vm1604_vm0, %v1605_v4 }
  0x81   :  { %1388 = vmatmul.mubr.msk.f32.gmra.mrb[56].mxu0 %vm84_vm1, %v49_v5 }
  0x82   :  { %1390 = vmatprep.mubr.msk.f32.mxu0 %vm1604_vm0, %v1605_v4 }
  0x85   :  { %1391 = vmatmul.mubr.msk.f32.gmra.mrb[58].mxu0 %vm84_vm1, %v50_v6  ;;  %v955_v6 = vld [vmem:[%s2326_s2 + $0x30] sm:$0xff] }
  0x86   :  { %1393 = vmatprep.mubr.msk.f32.mxu0 %vm1604_vm0, %v1605_v4 }
  0x89   :  { %1394 = vmatmul.mubr.msk.f32.gmra.mrb[60].mxu0 %vm84_vm1, %v51_v7  ;;  %v956_v7 = vld [vmem:[%s2326_s2 + $0x38] sm:$0xff] }
  0x8a   :  { %1396 = vmatprep.mubr.msk.f32.mxu0 %vm1604_vm0, %v1605_v4 }
  0x8d   :  { %1397 = vmatmul.mubr.msk.f32.gmra.mrb[62].mxu0 %vm84_vm1, %v52_v8 }
  0x8e   :  { %1399 = vmatprep.mubr.msk.f32.mxu0 %vm1604_vm0, %v1605_v4 }
  0x91   :  { %1400 = vmatmul.mubr.msk.f32.gmra.mrb[64].mxu0 %vm84_vm1, %v53_v9 }
  0x92   :  { %1402 = vmatprep.mubr.msk.f32.mxu0 %vm1604_vm0, %v1605_v4 }
  0x95   :  { %1403 = vmatmul.mubr.msk.f32.gmra.mrb[66].mxu0 %vm84_vm1, %v54_v10  ;;  %v1570_v10 = vpack.c.bf16 %v956_v7, %v955_v6 }
  0x96   :  { %1405 = vmatprep.mubr.msk.f32.mxu0 %vm1604_vm0, %v1605_v4 }
  0x97   :  { %1571 = vmatpush3.bf16.msra.mxu1 %v1570_v10 }
  0x98   :  { %1572 = vmatprep.subr.bf16.mxu1 %v1603_v0 }
  0x99   :  { %1406 = vmatmul.mubr.msk.f32.gmra.mrb[68].mxu0 %vm84_vm1, %v55_v11 }
  0x9a   :  { %1408 = vmatprep.mubr.msk.f32.mxu0 %vm1604_vm0, %v1605_v4 }
  0x9d   :  { %1409 = vmatmul.mubr.msk.f32.gmra.mrb[70].mxu0 %vm84_vm1, %v56_v12 }
  0xe4   :  { %v340_v13 = vpop.f32.mrb[0].mxu0  ;;  %v520_v14 = vpop.f32.mrb[0].mxu1 }
  0xe5   :  { %655 = vst.msk [vmem:[#allocation2] sm:$0xff] %vm654_vm2, %v340_v13  ;;  %v1305_v15 = vpop.f32.mrb[1].mxu0  ;;  %v1413_v16 = vpop.f32.mrb[1].mxu1  ;;  %811 = vrot.lane.b32.xlu1 %v520_v14, %s1606_s12  ;;  %v957_v13 = vld [vmem:[%s2326_s2 + $0x40] sm:$0xff]  ;;  %v958_v14 = vld [vmem:[%s2326_s2 + $0x48] sm:$0xff] }
  0xe6   :  { %v1573_v17 = vpack.c.bf16 %v958_v14, %v957_v13  ;;  %v963_v14 = vld [vmem:[%s2326_s2 + $0x70] sm:$0xff] }
  0xe8   :  { %v345_v20 = vpop.f32.mrb[2].mxu0  ;;  %v525_v21 = vpop.f32.mrb[2].mxu1  ;;  %1574 = vmatpush3.bf16.msra.mxu1 %v1573_v17 }
  0xe9   :  { %656 = vst.msk [vmem:[#allocation2 + $0x8] sm:$0xff] %vm654_vm2, %v345_v20  ;;  %v1308_v22 = vpop.f32.mrb[3].mxu0  ;;  %v1416_v23 = vpop.f32.mrb[3].mxu1  ;;  %813 = vrot.lane.b32.xlu1 %v525_v21, %s1606_s12  ;;  %1575 = vmatprep.subr.bf16.mxu1 %v1603_v0 }
  0xec   :  { %v350_v24 = vpop.f32.mrb[4].mxu0  ;;  %v530_v25 = vpop.f32.mrb[4].mxu1 }
  0xed   :  { %657 = vst.msk [vmem:[#allocation2 + $0x10] sm:$0xff] %vm654_vm2, %v350_v24  ;;  %v1311_v26 = vpop.f32.mrb[5].mxu0  ;;  %v1419_v27 = vpop.f32.mrb[5].mxu1  ;;  %815 = vrot.lane.b32.xlu1 %v530_v25, %s1606_s12 }
  0xf0   :  { %v355_v28 = vpop.f32.mrb[6].mxu0  ;;  %v535_v29 = vpop.f32.mrb[6].mxu1 }
  0xf1   :  { %658 = vst.msk [vmem:[#allocation2 + $0x18] sm:$0xff] %vm654_vm2, %v355_v28  ;;  %v1314_v30 = vpop.f32.mrb[7].mxu0  ;;  %v1422_v31 = vpop.f32.mrb[7].mxu1  ;;  %817 = vrot.lane.b32.xlu1 %v535_v29, %s1606_s12 }
  0xf4   :  { %v360_v32 = vpop.f32.mrb[8].mxu0  ;;  %v540_v33 = vpop.f32.mrb[8].mxu1 }
  0xf5   :  { %659 = vst.msk [vmem:[#allocation2 + $0x20] sm:$0xff] %vm654_vm2, %v360_v32  ;;  %v1317_v34 = vpop.f32.mrb[9].mxu0  ;;  %v1425_v35 = vpop.f32.mrb[9].mxu1  ;;  %819 = vrot.lane.b32.xlu1 %v540_v33, %s1606_s12 }
  0xf8   :  { %v365_v39 = vpop.f32.mrb[10].mxu0  ;;  %v545_v40 = vpop.f32.mrb[10].mxu1 }
  0xf9   :  { %660 = vst.msk [vmem:[#allocation2 + $0x28] sm:$0xff] %vm654_vm2, %v365_v39  ;;  %v1320_v41 = vpop.f32.mrb[11].mxu0  ;;  %v1428_v42 = vpop.f32.mrb[11].mxu1  ;;  %821 = vrot.lane.b32.xlu1 %v545_v40, %s1606_s12  ;;  %v959_v40 = vld [vmem:[%s2326_s2 + $0x50] sm:$0xff] }
  0xfa   :  { %v960_v41 = vld [vmem:[%s2326_s2 + $0x58] sm:$0xff] }
  0xfc   :  { %v370_v43 = vpop.f32.mrb[12].mxu0  ;;  %v2069_v44 = vpop.f32.mrb[12].mxu1 }
  0xfd   :  { %661 = vst.msk [vmem:[#allocation2 + $0x30] sm:$0xff] %vm654_vm2, %v370_v43  ;;  %v1323_v45 = vpop.f32.mrb[13].mxu0  ;;  %v1431_v46 = vpop.f32.mrb[13].mxu1 }
  0xfe   :  { %v1576_v45 = vpack.c.bf16 %v960_v41, %v959_v40 }
 0x100   :  { %v375_v47 = vpop.f32.mrb[14].mxu0  ;;  %v2072_v48 = vpop.f32.mrb[14].mxu1  ;;  %1577 = vmatpush3.bf16.msra.mxu1 %v1576_v45 }
 0x101   :  { %662 = vst.msk [vmem:[#allocation2 + $0x38] sm:$0xff] %vm654_vm2, %v375_v47  ;;  %v1326_v49 = vpop.f32.mrb[15].mxu0  ;;  %v1434_v50 = vpop.f32.mrb[15].mxu1  ;;  %1578 = vmatprep.subr.bf16.mxu1 %v1603_v0 }
 0x104   :  { %v380_v51 = vpop.f32.mrb[16].mxu0  ;;  %v2075_v52 = vpop.f32.mrb[16].mxu1 }
 0x105   :  { %663 = vst.msk [vmem:[#allocation2 + $0x40] sm:$0xff] %vm654_vm2, %v380_v51  ;;  %v1329_v55 = vpop.f32.mrb[17].mxu0  ;;  %v1437_v56 = vpop.f32.mrb[17].mxu1 }
 0x108   :  { %v385_v58 = vpop.f32.mrb[18].mxu0  ;;  %v565_v59 = vpop.f32.mrb[18].mxu1 }
 0x109   :  { %673 = vrot.lane.b32.xlu0 %v385_v58, %s1607_s24  ;;  %v1332_v60 = vpop.f32.mrb[19].mxu0  ;;  %v1440_v61 = vpop.f32.mrb[19].mxu1  ;;  %857 = vrot.lane.b32.xlu1 %v565_v59, %s1608_s25  ;;  %v961_v58 = vld [vmem:[%s2326_s2 + $0x60] sm:$0xff]  ;;  %v962_v59 = vld [vmem:[%s2326_s2 + $0x68] sm:$0xff] }
 0x10c   :  { %v390_v62 = vpop.f32.mrb[20].mxu0  ;;  %v570_v63 = vpop.f32.mrb[20].mxu1 }
 0x10d   :  { %675 = vrot.lane.b32.xlu0 %v390_v62, %s1607_s24  ;;  %v1335_v1 = vpop.f32.mrb[21].mxu0  ;;  %v1443_v2 = vpop.f32.mrb[21].mxu1  ;;  %859 = vrot.lane.b32.xlu1 %v570_v63, %s1608_s25  ;;  %v1579_v62 = vpack.c.bf16 %v962_v59, %v961_v58 }
 0x10f   :  { %1580 = vmatpush3.bf16.msra.mxu1 %v1579_v62 }
 0x110   :  { %v395_v3 = vpop.f32.mrb[22].mxu0  ;;  %v575_v5 = vpop.f32.mrb[22].mxu1  ;;  %1581 = vmatprep.subr.bf16.mxu1 %v1603_v0 }
 0x111   :  { %677 = vrot.lane.b32.xlu0 %v395_v3, %s1607_s24  ;;  %v1338_v8 = vpop.f32.mrb[23].mxu0  ;;  %v1446_v9 = vpop.f32.mrb[23].mxu1  ;;  %861 = vrot.lane.b32.xlu1 %v575_v5, %s1608_s25 }
 0x114   :  { %v400_v11 = vpop.f32.mrb[24].mxu0  ;;  %v580_v12 = vpop.f32.mrb[24].mxu1 }
 0x115   :  { %679 = vrot.lane.b32.xlu0 %v400_v11, %s1607_s24  ;;  %v1341_v15 = vpop.f32.mrb[25].mxu0  ;;  %v1449_v16 = vpop.f32.mrb[25].mxu1  ;;  %863 = vrot.lane.b32.xlu1 %v580_v12, %s1608_s25 }
 0x116   :  { %v964_v15 = vld [vmem:[%s2326_s2 + $0x78] sm:$0x3f]  ;;  %s1612_s2 = smov 54  }
 0x118   :  { %v405_v18 = vpop.f32.mrb[26].mxu0  ;;  %v585_v19 = vpop.f32.mrb[26].mxu1 }
 0x119   :  { %681 = vrot.lane.b32.xlu0 %v405_v18, %s1607_s24  ;;  %v1344_v20 = vpop.f32.mrb[27].mxu0  ;;  %v1452_v21 = vpop.f32.mrb[27].mxu1  ;;  %865 = vrot.lane.b32.xlu1 %v585_v19, %s1608_s25  ;;  %v1582_v18 = vpack.c.bf16 %v964_v15, %v963_v14 }
 0x11b   :  { %1584 = vmatpush3.bf16.msk.msra.mxu1 %vm1583_vm5, %v1582_v18 }
 0x11c   :  { %v410_v22 = vpop.f32.mrb[28].mxu0  ;;  %v590_v23 = vpop.f32.mrb[28].mxu1 }
 0x11d   :  { %683 = vrot.lane.b32.xlu0 %v410_v22, %s1607_s24  ;;  %v1347_v24 = vpop.f32.mrb[29].mxu0  ;;  %v1455_v25 = vpop.f32.mrb[29].mxu1  ;;  %867 = vrot.lane.b32.xlu1 %v590_v23, %s1608_s25 }
 0x120   :  { %v415_v26 = vpop.f32.mrb[30].mxu0  ;;  %v2111_v27 = vpop.f32.mrb[30].mxu1 }
 0x121   :  { %685 = vrot.lane.b32.xlu0 %v415_v26, %s1607_s24  ;;  %v1350_v28 = vpop.f32.mrb[31].mxu0  ;;  %v1458_v29 = vpop.f32.mrb[31].mxu1 }
 0x124   :  { %v2114_v30 = vpop.f32.mrb[32].mxu0  ;;  %v2116_v31 = vpop.f32.mrb[32].mxu1 }
 0x125   :  { %v1353_v32 = vpop.f32.mrb[33].mxu0  ;;  %v1461_v33 = vpop.f32.mrb[33].mxu1 }
 0x128   :  { %v2118_v34 = vpop.f32.mrb[34].mxu0  ;;  %v2120_v35 = vpop.f32.mrb[34].mxu1 }
 0x129   :  { %v1356_v36 = vpop.f32.mrb[35].mxu0  ;;  %v1464_v37 = vpop.f32.mrb[35].mxu1 }
 0x12c   :  { %v430_v38 = vpop.f32.mrb[36].mxu0  ;;  %v610_v39 = vpop.f32.mrb[36].mxu1 }
 0x12d   :  { %719 = vrot.lane.b32.xlu0 %v430_v38, %s1609_s10  ;;  %v1359_v42 = vpop.f32.mrb[37].mxu0  ;;  %903 = vrot.lane.b32.xlu1 %v610_v39, %s1610_s11  ;;  %v1467_v43 = vpop.f32.mrb[37].mxu1 }
 0x130   :  { %v435_v46 = vpop.f32.mrb[38].mxu0  ;;  %v615_v47 = vpop.f32.mrb[38].mxu1 }
 0x131   :  { %721 = vrot.lane.b32.xlu0 %v435_v46, %s1609_s10  ;;  %v1362_v49 = vpop.f32.mrb[39].mxu0  ;;  %905 = vrot.lane.b32.xlu1 %v615_v47, %s1610_s11  ;;  %v1470_v50 = vpop.f32.mrb[39].mxu1 }
 0x134   :  { %v440_v51 = vpop.f32.mrb[40].mxu0  ;;  %v620_v53 = vpop.f32.mrb[40].mxu1 }
 0x135   :  { %723 = vrot.lane.b32.xlu0 %v440_v51, %s1609_s10  ;;  %v1365_v54 = vpop.f32.mrb[41].mxu0  ;;  %907 = vrot.lane.b32.xlu1 %v620_v53, %s1610_s11  ;;  %v1473_v55 = vpop.f32.mrb[41].mxu1 }
 0x138   :  { %v445_v56 = vpop.f32.mrb[42].mxu0  ;;  %v625_v57 = vpop.f32.mrb[42].mxu1 }
 0x139   :  { %725 = vrot.lane.b32.xlu0 %v445_v56, %s1609_s10  ;;  %v1368_v60 = vpop.f32.mrb[43].mxu0  ;;  %909 = vrot.lane.b32.xlu1 %v625_v57, %s1610_s11  ;;  %v1476_v61 = vpop.f32.mrb[43].mxu1 }
 0x13c   :  { %v450_v63 = vpop.f32.mrb[44].mxu0  ;;  %v630_v1 = vpop.f32.mrb[44].mxu1 }
 0x13d   :  { %727 = vrot.lane.b32.xlu0 %v450_v63, %s1609_s10  ;;  %v1371_v2 = vpop.f32.mrb[45].mxu0  ;;  %911 = vrot.lane.b32.xlu1 %v630_v1, %s1610_s11  ;;  %v1479_v3 = vpop.f32.mrb[45].mxu1 }
 0x140   :  { %v455_v5 = vpop.f32.mrb[46].mxu0  ;;  %v635_v6 = vpop.f32.mrb[46].mxu1 }
 0x141   :  { %729 = vrot.lane.b32.xlu0 %v455_v5, %s1609_s10  ;;  %v1374_v7 = vpop.f32.mrb[47].mxu0  ;;  %v1482_v8 = vpop.f32.mrb[47].mxu1 }
 0x144   :  { %v460_v9 = vpop.f32.mrb[48].mxu0  ;;  %v640_v10 = vpop.f32.mrb[48].mxu1 }
 0x145   :  { %731 = vrot.lane.b32.xlu0 %v460_v9, %s1609_s10  ;;  %v1377_v11 = vpop.f32.mrb[49].mxu0  ;;  %v1485_v12 = vpop.f32.mrb[49].mxu1 }
 0x148   :  { %v465_v13 = vpop.f32.mrb[50].mxu0  ;;  %v645_v0 = vpop.f32.mrb[50].mxu1 }
 0x149   :  { %687 = vrot.lane.b32.xlu0 %v2114_v30, %s1607_s24  ;;  %v1380_v16 = vpop.f32.mrb[51].mxu0  ;;  %v1488_v17 = vpop.f32.mrb[51].mxu1 }
 0x14c   :  { %v470_v19 = vpop.f32.mrb[52].mxu0  ;;  %v650_v20 = vpop.f32.mrb[52].mxu1 }
 0x14d   :  { %733 = vrot.lane.b32.xlu0 %v465_v13, %s1609_s10  ;;  %v1383_v21 = vpop.f32.mrb[53].mxu0  ;;  %v1491_v22 = vpop.f32.mrb[53].mxu1 }
 0x150   :  { %v475_v23 = vpop.f32.mrb[54].mxu0 }
 0x151   :  { %689 = vrot.lane.b32.xlu0 %v2118_v34, %s1607_s24  ;;  %765 = vrot.lane.b32.xlu1 %v475_v23, %s1612_s2  ;;  %v1386_v24 = vpop.f32.mrb[55].mxu0 }
 0x154   :  { %v480_v25 = vpop.f32.mrb[56].mxu0 }
 0x155   :  { %735 = vrot.lane.b32.xlu0 %v470_v19, %s1609_s10  ;;  %913 = vrot.lane.b32.xlu1 %v635_v6, %s1610_s11  ;;  %v1389_v26 = vpop.f32.mrb[57].mxu0 }
 0x157   :  { %v2170_v36 = vpop.permute.xlu1 %811 }
 0x158   :  { %v485_v28 = vpop.f32.mrb[58].mxu0 }
 0x159   :  { %823 = vrot.lane.b32.xlu1 %v2069_v44, %s1606_s12  ;;  %767 = vrot.lane.b32.xlu0 %v480_v25, %s1612_s2  ;;  %v1392_v29 = vpop.f32.mrb[59].mxu0 }
 0x15b   :  { %v2175_v38 = vpop.permute.xlu1 %813 }
 0x15c   :  { %v490_v30 = vpop.f32.mrb[60].mxu0 }
 0x15d   :  { %869 = vrot.lane.b32.xlu1 %v2111_v27, %s1608_s25  ;;  %769 = vrot.lane.b32.xlu0 %v485_v28, %s1612_s2  ;;  %v1395_v32 = vpop.f32.mrb[61].mxu0 }
 0x15f   :  { %v2182_v42 = vpop.permute.xlu1 %815 }
 0x160   :  { %v495_v33 = vpop.f32.mrb[62].mxu0 }
 0x161   :  { %915 = vrot.lane.b32.xlu1 %v640_v10, %s1610_s11  ;;  %771 = vrot.lane.b32.xlu0 %v490_v30, %s1612_s2  ;;  %v1398_v34 = vpop.f32.mrb[63].mxu0 }
 0x163   :  { %v2187_v45 = vpop.permute.xlu1 %817 }
 0x164   :  { %v500_v37 = vpop.f32.mrb[64].mxu0 }
 0x165   :  { %825 = vrot.lane.b32.xlu1 %v2072_v48, %s1606_s12  ;;  %773 = vrot.lane.b32.xlu0 %v495_v33, %s1612_s2  ;;  %v1401_v44 = vpop.f32.mrb[65].mxu0 }
 0x168   :  { %v505_v27 = vpop.f32.mrb[66].mxu0 }
 0x169   :  { %871 = vrot.lane.b32.xlu1 %v2116_v31, %s1608_s25  ;;  %775 = vrot.lane.b32.xlu0 %v500_v37, %s1612_s2  ;;  %v1404_v39 = vpop.f32.mrb[67].mxu0  ;;  %v2193_v31 = vpop.permute.xlu1 %819 }
 0x16c   :  { %v510_v40 = vpop.f32.mrb[68].mxu0 }
 0x16d   :  { %917 = vrot.lane.b32.xlu1 %v645_v0, %s1610_s11  ;;  %777 = vrot.lane.b32.xlu0 %v505_v27, %s1612_s2  ;;  %v1407_v41 = vpop.f32.mrb[69].mxu0 }
 0x170   :  { %v515_v48 = vpop.f32.mrb[70].mxu0 }
 0x171   :  { %827 = vrot.lane.b32.xlu1 %v2075_v52, %s1606_s12  ;;  %779 = vrot.lane.b32.xlu0 %v510_v40, %s1612_s2  ;;  %v1410_v43 = vpop.f32.mrb[71].mxu0  ;;  %v2196_v52 = vpop.permute.xlu1 %821 }
 0x175   :  { %781 = vrot.lane.b32.xlu0 %v515_v48, %s1612_s2  ;;  %919 = vrot.lane.b32.xlu1 %v650_v20, %s1610_s11 }
 0x179   :  { %873 = vrot.lane.b32.xlu0 %v2120_v35, %s1608_s25 }
 0x17b   :  { %v674_v46 = vpop.permute.xlu0 %673  ;;  %v858_v50 = vpop.permute.xlu1 %857 }
 0x17c   :  { %701 = vst.msk [vmem:[#allocation2] sm:$0xff] %vm700_vm6, %v674_v46 }
 0x17f   :  { %v676_v47 = vpop.permute.xlu0 %675  ;;  %v860_v53 = vpop.permute.xlu1 %859 }
 0x180   :  { %702 = vst.msk [vmem:[#allocation2 + $0x8] sm:$0xff] %vm700_vm6, %v676_v47 }
 0x183   :  { %v678_v49 = vpop.permute.xlu0 %677  ;;  %v862_v55 = vpop.permute.xlu1 %861 }
 0x184   :  { %703 = vst.msk [vmem:[#allocation2 + $0x10] sm:$0xff] %vm700_vm6, %v678_v49 }
 0x187   :  { %v680_v51 = vpop.permute.xlu0 %679  ;;  %v864_v57 = vpop.permute.xlu1 %863 }
 0x188   :  { %704 = vst.msk [vmem:[#allocation2 + $0x18] sm:$0xff] %vm700_vm6, %v680_v51 }
 0x18b   :  { %v682_v35 = vpop.permute.xlu0 %681  ;;  %v2204_v58 = vpop.permute.xlu1 %865 }
 0x18c   :  { %705 = vst.msk [vmem:[#allocation2 + $0x20] sm:$0xff] %vm700_vm6, %v682_v35 }
 0x18f   :  { %v684_v54 = vpop.permute.xlu0 %683  ;;  %v2207_v60 = vpop.permute.xlu1 %867 }
 0x190   :  { %706 = vst.msk [vmem:[#allocation2 + $0x28] sm:$0xff] %vm700_vm6, %v684_v54 }
 0x193   :  { %v686_v56 = vpop.permute.xlu0 %685 }
 0x194   :  { %707 = vst.msk [vmem:[#allocation2 + $0x30] sm:$0xff] %vm700_vm6, %v686_v56 }
 0x19f   :  { %v720_v59 = vpop.permute.xlu0 %719  ;;  %v904_v62 = vpop.permute.xlu1 %903 }
 0x1a0   :  { %747 = vst.msk [vmem:[#allocation2] sm:$0xff] %vm746_vm7, %v720_v59 }
 0x1a3   :  { %v722_v61 = vpop.permute.xlu0 %721  ;;  %v906_v2 = vpop.permute.xlu1 %905 }
 0x1a4   :  { %748 = vst.msk [vmem:[#allocation2 + $0x8] sm:$0xff] %vm746_vm7, %v722_v61 }
 0x1a7   :  { %v724_v63 = vpop.permute.xlu0 %723  ;;  %v908_v5 = vpop.permute.xlu1 %907 }
 0x1a8   :  { %749 = vst.msk [vmem:[#allocation2 + $0x10] sm:$0xff] %vm746_vm7, %v724_v63 }
 0x1ab   :  { %v726_v1 = vpop.permute.xlu0 %725  ;;  %v910_v8 = vpop.permute.xlu1 %909 }
 0x1ac   :  { %750 = vst.msk [vmem:[#allocation2 + $0x18] sm:$0xff] %vm746_vm7, %v726_v1 }
 0x1af   :  { %v728_v3 = vpop.permute.xlu0 %727  ;;  %v912_v10 = vpop.permute.xlu1 %911 }
 0x1b0   :  { %751 = vst.msk [vmem:[#allocation2 + $0x20] sm:$0xff] %vm746_vm7, %v728_v3 }
 0x1b3   :  { %v730_v6 = vpop.permute.xlu0 %729 }
 0x1b4   :  { %752 = vst.msk [vmem:[#allocation2 + $0x28] sm:$0xff] %vm746_vm7, %v730_v6 }
 0x1b7   :  { %v732_v7 = vpop.permute.xlu0 %731 }
 0x1b8   :  { %753 = vst.msk [vmem:[#allocation2 + $0x30] sm:$0xff] %vm746_vm7, %v732_v7 }
 0x1bb   :  { %v688_v9 = vpop.permute.xlu0 %687 }
 0x1bc   :  { %708 = vst.msk [vmem:[#allocation2 + $0x38] sm:$0xff] %vm700_vm6, %v688_v9 }
 0x1bf   :  { %v734_v11 = vpop.permute.xlu0 %733 }
 0x1c0   :  { %754 = vst.msk [vmem:[#allocation2 + $0x38] sm:$0xff] %vm746_vm7, %v734_v11 }
 0x1c3   :  { %v690_v12 = vpop.permute.xlu0 %689  ;;  %v766_v13 = vpop.permute.xlu1 %765 }
 0x1c4   :  { %709 = vst.msk [vmem:[#allocation2 + $0x40] sm:$0xff] %vm700_vm6, %v690_v12 }
 0x1c5   :  { %793 = vst.msk [vmem:[#allocation2] sm:$0xff] %vm792_vm8, %v766_v13 }
 0x1c6   :  { %839 = vst.msk [vmem:[#allocation2] sm:$0xff] %vm838_vm9, %v2170_v36 }
 0x1c7   :  { %885 = vst.msk [vmem:[#allocation2] sm:$0xff] %vm884_vm10, %v858_v50  ;;  %v736_v0 = vpop.permute.xlu0 %735  ;;  %v914_v14 = vpop.permute.xlu1 %913 }
 0x1c8   :  { %931 = vst.msk [vmem:[#allocation2] sm:$0xff] %vm930_vm11, %v904_v62 }
 0x1c9   :  { %755 = vst.msk [vmem:[#allocation2 + $0x40] sm:$0xff] %vm746_vm7, %v736_v0 }
 0x1cb   :  { %v824_v15 = vpop.permute.xlu1 %823  ;;  %v768_v16 = vpop.permute.xlu0 %767 }
 0x1cc   :  { %794 = vst.msk [vmem:[#allocation2 + $0x8] sm:$0xff] %vm792_vm8, %v768_v16 }
 0x1cd   :  { %840 = vst.msk [vmem:[#allocation2 + $0x8] sm:$0xff] %vm838_vm9, %v2175_v38 }
 0x1ce   :  { %886 = vst.msk [vmem:[#allocation2 + $0x8] sm:$0xff] %vm884_vm10, %v860_v53 }
 0x1cf   :  { %v940_v17 = vld [vmem:[#allocation2] sm:$0xff]  ;;  %932 = vst.msk [vmem:[#allocation2 + $0x8] sm:$0xff] %vm930_vm11, %v906_v2  ;;  %v870_v18 = vpop.permute.xlu1 %869  ;;  %v770_v19 = vpop.permute.xlu0 %769 }
 0x1d0   :  { %1525 = vmatmul.mubr.msk.f32.vlgmr.msra.gmra.mrb[54].mxu1 %vm965_vm12, %v940_v17  ;;  %795 = vst.msk [vmem:[#allocation2 + $0x10] sm:$0xff] %vm792_vm8, %v770_v19 }
 0x1d1   :  { %1527 = vmatprep.mubr.msk.f32.mxu1 %vm1604_vm0, %v1605_v4  ;;  %841 = vst.msk [vmem:[#allocation2 + $0x10] sm:$0xff] %vm838_vm9, %v2182_v42 }
 0x1d2   :  { %887 = vst.msk [vmem:[#allocation2 + $0x10] sm:$0xff] %vm884_vm10, %v862_v55 }
 0x1d3   :  { %933 = vst.msk [vmem:[#allocation2 + $0x10] sm:$0xff] %vm930_vm11, %v908_v5  ;;  %v916_v20 = vpop.permute.xlu1 %915  ;;  %v772_v21 = vpop.permute.xlu0 %771 }
 0x1d4   :  { %796 = vst.msk [vmem:[#allocation2 + $0x18] sm:$0xff] %vm792_vm8, %v772_v21 }
 0x1d5   :  { %842 = vst.msk [vmem:[#allocation2 + $0x18] sm:$0xff] %vm838_vm9, %v2187_v45 }
 0x1d6   :  { %888 = vst.msk [vmem:[#allocation2 + $0x18] sm:$0xff] %vm884_vm10, %v864_v57  ;;  %v941_v22 = vld [vmem:[#allocation2 + $0x8] sm:$0xff] }
 0x1d7   :  { %934 = vst.msk [vmem:[#allocation2 + $0x18] sm:$0xff] %vm930_vm11, %v910_v8  ;;  %v826_v23 = vpop.permute.xlu1 %825  ;;  %1528 = vmatmul.mubr.msk.f32.gmra.mrb[56].mxu1 %vm965_vm12, %v941_v22  ;;  %v774_v24 = vpop.permute.xlu0 %773 }
 0x1d8   :  { %797 = vst.msk [vmem:[#allocation2 + $0x20] sm:$0xff] %vm792_vm8, %v774_v24  ;;  %1530 = vmatprep.mubr.msk.f32.mxu1 %vm1604_vm0, %v1605_v4 }
 0x1d9   :  { %843 = vst.msk [vmem:[#allocation2 + $0x20] sm:$0xff] %vm838_vm9, %v2193_v31 }
 0x1da   :  { %889 = vst.msk [vmem:[#allocation2 + $0x20] sm:$0xff] %vm884_vm10, %v2204_v58  ;;  %v942_v25 = vld [vmem:[#allocation2 + $0x10] sm:$0xff] }
 0x1db   :  { %935 = vst.msk [vmem:[#allocation2 + $0x20] sm:$0xff] %vm930_vm11, %v912_v10  ;;  %v872_v26 = vpop.permute.xlu1 %871  ;;  %1531 = vmatmul.mubr.msk.f32.gmra.mrb[58].mxu1 %vm965_vm12, %v942_v25  ;;  %v776_v28 = vpop.permute.xlu0 %775 }
 0x1dc   :  { %798 = vst.msk [vmem:[#allocation2 + $0x28] sm:$0xff] %vm792_vm8, %v776_v28  ;;  %1533 = vmatprep.mubr.msk.f32.mxu1 %vm1604_vm0, %v1605_v4 }
 0x1dd   :  { %844 = vst.msk [vmem:[#allocation2 + $0x28] sm:$0xff] %vm838_vm9, %v2196_v52 }
 0x1de   :  { %890 = vst.msk [vmem:[#allocation2 + $0x28] sm:$0xff] %vm884_vm10, %v2207_v60  ;;  %v943_v29 = vld [vmem:[#allocation2 + $0x18] sm:$0xff] }
 0x1df   :  { %936 = vst.msk [vmem:[#allocation2 + $0x28] sm:$0xff] %vm930_vm11, %v914_v14  ;;  %1534 = vmatmul.mubr.msk.f32.gmra.mrb[60].mxu1 %vm965_vm12, %v943_v29  ;;  %v778_v30 = vpop.permute.xlu0 %777  ;;  %v918_v32 = vpop.permute.xlu1 %917 }
 0x1e0   :  { %799 = vst.msk [vmem:[#allocation2 + $0x30] sm:$0xff] %vm792_vm8, %v778_v30  ;;  %1536 = vmatprep.mubr.msk.f32.mxu1 %vm1604_vm0, %v1605_v4 }
 0x1e1   :  { %845 = vst.msk [vmem:[#allocation2 + $0x30] sm:$0xff] %vm838_vm9, %v824_v15 }
 0x1e2   :  { %891 = vst.msk [vmem:[#allocation2 + $0x30] sm:$0xff] %vm884_vm10, %v870_v18  ;;  %v944_v33 = vld [vmem:[#allocation2 + $0x20] sm:$0xff] }
 0x1e3   :  { %937 = vst.msk [vmem:[#allocation2 + $0x30] sm:$0xff] %vm930_vm11, %v916_v20  ;;  %1537 = vmatmul.mubr.msk.f32.gmra.mrb[62].mxu1 %vm965_vm12, %v944_v33  ;;  %v780_v34 = vpop.permute.xlu0 %779  ;;  %v828_v36 = vpop.permute.xlu1 %827 }
 0x1e4   :  { %800 = vst.msk [vmem:[#allocation2 + $0x38] sm:$0xff] %vm792_vm8, %v780_v34  ;;  %1539 = vmatprep.mubr.msk.f32.mxu1 %vm1604_vm0, %v1605_v4 }
 0x1e5   :  { %846 = vst.msk [vmem:[#allocation2 + $0x38] sm:$0xff] %vm838_vm9, %v826_v23 }
 0x1e6   :  { %892 = vst.msk [vmem:[#allocation2 + $0x38] sm:$0xff] %vm884_vm10, %v872_v26  ;;  %v945_v37 = vld [vmem:[#allocation2 + $0x28] sm:$0xff] }
 0x1e7   :  { %938 = vst.msk [vmem:[#allocation2 + $0x38] sm:$0xff] %vm930_vm11, %v918_v32  ;;  %1540 = vmatmul.mubr.msk.f32.gmra.mrb[64].mxu1 %vm965_vm12, %v945_v37  ;;  %v782_v44 = vpop.permute.xlu0 %781  ;;  %v920_v27 = vpop.permute.xlu1 %919 }
 0x1e8   :  { %801 = vst.msk [vmem:[#allocation2 + $0x40] sm:$0xff] %vm792_vm8, %v782_v44  ;;  %1542 = vmatprep.mubr.msk.f32.mxu1 %vm1604_vm0, %v1605_v4 }
 0x1e9   :  { %847 = vst.msk [vmem:[#allocation2 + $0x40] sm:$0xff] %vm838_vm9, %v828_v36 }
 0x1ea   :  { %v946_v38 = vld [vmem:[#allocation2 + $0x30] sm:$0xff] }
 0x1eb   :  { %1543 = vmatmul.mubr.msk.f32.gmra.mrb[66].mxu1 %vm965_vm12, %v946_v38  ;;  %v874_v39 = vpop.permute.xlu0 %873 }
 0x1ec   :  { %893 = vst.msk [vmem:[#allocation2 + $0x40] sm:$0xff] %vm884_vm10, %v874_v39  ;;  %1545 = vmatprep.mubr.msk.f32.mxu1 %vm1604_vm0, %v1605_v4 }
 0x1ed   :  { %939 = vst.msk [vmem:[#allocation2 + $0x40] sm:$0xff] %vm930_vm11, %v920_v27 }
 0x1ee   :  { %v947_v40 = vld [vmem:[#allocation2 + $0x38] sm:$0xff] }
 0x1ef   :  { %1546 = vmatmul.mubr.msk.f32.gmra.mrb[68].mxu1 %vm965_vm12, %v947_v40 }
 0x1f0   :  { %1548 = vmatprep.mubr.msk.f32.mxu1 %vm1604_vm0, %v1605_v4 }
 0x1f4   :  { %v948_v41 = vld [vmem:[#allocation2 + $0x40] sm:$0xff] }
 0x1f5   :  { %1549 = vmatmul.mubr.msk.f32.gmra.mrb[70].mxu1 %vm965_vm12, %v948_v41 }
 0x2a3   :  { %v1063_v42 = vpop.f32.mrb[54].mxu1 }
 0x2a4   :  { %1108 = vst.msk [vmem:[%s2327_s3] sm:$0xff] %vm1107_vm13, %v1063_v42  ;;  %v1526_v48 = vpop.f32.mrb[55].mxu1 }
 0x2aa   :  { %v1068_v43 = vpop.f32.mrb[56].mxu1 }
 0x2ab   :  { %1109 = vst.msk [vmem:[%s2327_s3 + $0x8] sm:$0xff] %vm1107_vm13, %v1068_v43  ;;  %v1529_v45 = vpop.f32.mrb[57].mxu1 }
 0x2ae   :  { %v1073_v31 = vpop.f32.mrb[58].mxu1 }
 0x2af   :  { %1110 = vst.msk [vmem:[%s2327_s3 + $0x10] sm:$0xff] %vm1107_vm13, %v1073_v31  ;;  %v1532_v4 = vpop.f32.mrb[59].mxu1 }
 0x2b2   :  { %v1078_v46 = vpop.f32.mrb[60].mxu1 }
 0x2b3   :  { %1111 = vst.msk [vmem:[%s2327_s3 + $0x18] sm:$0xff] %vm1107_vm13, %v1078_v46  ;;  %v1535_v47 = vpop.f32.mrb[61].mxu1 }
 0x2b6   :  { %v1083_v52 = vpop.f32.mrb[62].mxu1 }
 0x2b7   :  { %1112 = vst.msk [vmem:[%s2327_s3 + $0x20] sm:$0xff] %vm1107_vm13, %v1083_v52  ;;  %v1538_v49 = vpop.f32.mrb[63].mxu1 }
 0x2ba   :  { %v1088_v50 = vpop.f32.mrb[64].mxu1 }
 0x2bb   :  { %1113 = vst.msk [vmem:[%s2327_s3 + $0x28] sm:$0xff] %vm1107_vm13, %v1088_v50  ;;  %v1541_v51 = vpop.f32.mrb[65].mxu1 }
 0x2be   :  { %v1093_v53 = vpop.f32.mrb[66].mxu1 }
 0x2bf   :  { %1114 = vst.msk [vmem:[%s2327_s3 + $0x30] sm:$0xff] %vm1107_vm13, %v1093_v53  ;;  %v1544_v35 = vpop.f32.mrb[67].mxu1 }
 0x2c2   :  { %v1098_v54 = vpop.f32.mrb[68].mxu1 }
 0x2c3   :  { %1115 = vst.msk [vmem:[%s2327_s3 + $0x38] sm:$0xff] %vm1107_vm13, %v1098_v54  ;;  %v1547_v55 = vpop.f32.mrb[69].mxu1 }
 0x2c8   :  { %v1103_v56 = vpop.f32.mrb[70].mxu1 }
 0x2c9   :  { %1116 = vst.msk [vmem:[%s2327_s3 + $0x40] sm:$0xff] %vm1107_vm13, %v1103_v56  ;;  %v1550_v57 = vpop.f32.mrb[71].mxu1 }

</bundles_post_ra>
